<compile_context>
chip_gen: v6e
topology: v6e:2x2x1
jax: 0.10.0
libtpu: 0.0.40
codegen_flags: <defaults>
</compile_context>

<pallas_src>
import jax
import jax.numpy as jnp
from jax.experimental import pallas as pl
from jax.experimental.pallas import tpu as pltpu

_LANE = 128
_WIDTHS = (4096, 2048, 1024, 512, 256, 128)

_SMALL_BYTES = 256 * 1024              # below this, plain fused XLA wins
_BLOCK_CAP_BYTES = 4 * 1024 * 1024     # 2-D fast path: max bytes per block
_BLOCK_FLOOR_BYTES = 512 * 1024        # 2-D fast path: min bytes per block
_RAGGED_CAP_BYTES = 256 * 1024         # ragged path: logical bytes per block
_RAGGED_FLOOR_BYTES = 64 * 1024        # (kept small: (1, n) blocks pad 8x in VMEM)
_MIN_BLOCKS = 8                        # >= 4 grid steps per v7x TensorCore
_VMEM_LIMIT_BYTES = 32 * 1024 * 1024   # safe on v5e / v6e / v7x


def _cdiv(a: int, b: int) -> int:
    return (a + b - 1) // b


def _sublane(itemsize: int) -> int:
    # Sublane packing: 8 rows for f32, 16 for bf16, 32 for 8-bit dtypes.
    return max(8, 32 // itemsize)


def _tanh_scale_kernel(scale_ref, x_ref, o_ref):
    # scale_ref lives in SMEM (scalar prefetch).  Compute in f32 (matches the
    # PyTorch reference for bf16 inputs; free under the HBM roofline), then
    # cast back to the output dtype.  tanh rides the EUP slot, the scale
    # multiply rides the VPU slot -- both hidden under the HBM roofline.
    x = x_ref[...].astype(jnp.float32)
    o_ref[...] = (jnp.tanh(x) * scale_ref[0]).astype(o_ref.dtype)


def _pick_width(n: int, sublane: int):
    """Widest lane width (multiple of 128) that divides n; prefer widths whose
    row count is a multiple of the sublane packing (fully packed vregs)."""
    for w in _WIDTHS:
        if n % w == 0 and (n // w) % sublane == 0:
            return w
    for w in _WIDTHS:
        if n % w == 0 and (n // w) >= sublane:
            return w
    for w in _WIDTHS:
        if n % w == 0:
            return w
    return None


def _pick_block_granules(total: int, granule_bytes: int,
                         cap_bytes: int, floor_bytes: int) -> int:
    """Choose granules per block.

    Respect a per-block byte cap, keep a floor so each block's DMA stays
    efficient, and aim for >= _MIN_BLOCKS blocks (>= 4 per v7x TensorCore)
    whenever the data is large enough.  Prefer an even block count (balanced
    two-core split) and an exact divisor of `total` (no tiny tail block).
    """
    cap = max(1, cap_bytes // granule_bytes)
    floor = max(1, min(cap, floor_bytes // granule_bytes))
    n_min = _cdiv(total, cap)                    # blocks forced by the cap
    n_max = max(n_min, total // floor, 1)        # blocks allowed by the floor
    n = min(total, max(n_min, min(_MIN_BLOCKS, n_max)))
    if n > 1 and n % 2 == 1 and (n + 1) <= min(total, n_max):
        n += 1                                   # even count -> balanced v7x split
    per = _cdiv(total, n)
    for cand in range(per, min(per + 4, cap) + 1):
        if total % cand == 0:                    # avoid a tiny ragged tail block
            return cand
    return per


def _launch(slab: jax.Array, scale_arr: jax.Array,
            block_shape, index_map, num_blocks: int) -> jax.Array:
    return pl.pallas_call(
        _tanh_scale_kernel,
        out_shape=jax.ShapeDtypeStruct(slab.shape, slab.dtype),
        grid_spec=pltpu.PrefetchScalarGridSpec(
            num_scalar_prefetch=1,               # scale -> SMEM
            grid=(num_blocks,),
            in_specs=[pl.BlockSpec(block_shape, index_map)],
            out_specs=pl.BlockSpec(block_shape, index_map),
        ),
        compiler_params=pltpu.CompilerParams(
            dimension_semantics=("parallel",),
            vmem_limit_bytes=_VMEM_LIMIT_BYTES,
        ),
    )(scale_arr, slab)


def tanh_scale(x: jax.Array, scale=1.0) -> jax.Array:
    """tanh(x) * scale. Shape/dtype preserved; one HBM read + one write of x."""
    orig_shape = x.shape
    n = x.size
    if n == 0:
        return x
    itemsize = jnp.dtype(x.dtype).itemsize

    # Tiny tensors: pallas_call launch + pipeline prime costs more than the op.
    if n * itemsize < _SMALL_BYTES:
        return (jnp.tanh(x.astype(jnp.float32)) * scale).astype(x.dtype)

    scale_arr = jnp.asarray(scale, dtype=jnp.float32).reshape((1,))
    sub = _sublane(itemsize)
    width = _pick_width(n, sub)

    if width is not None:
        # Fast path: free row-major reshape to a lane-dense (rows, width) slab.
        rows = n // width
        slab = x.reshape(rows, width)
        groups = _cdiv(rows, sub)                       # sublane groups of rows
        per = _pick_block_granules(groups, sub * width * itemsize,
                                   _BLOCK_CAP_BYTES, _BLOCK_FLOOR_BYTES)
        tile_rows = min(rows, per * sub)
        out = _launch(slab, scale_arr, (tile_rows, width),
                      lambda i, s: (i, 0), _cdiv(rows, tile_rows))
    else:
        # Ragged (n % 128 != 0): run the grid over the unpadded (1, n) view;
        # the final partial block is masked by Pallas.  No pad, no slice.
        slab = x.reshape(1, n)
        granule = sub * _LANE                           # elements per granule
        units = _cdiv(n, granule)
        per = _pick_block_granules(units, granule * itemsize,
                                   _RAGGED_CAP_BYTES, _RAGGED_FLOOR_BYTES)
        blk = min(n, per * granule)
        out = _launch(slab, scale_arr, (1, blk),
                      lambda i, s: (0, i), _cdiv(n, blk))

    return out.reshape(orig_shape)


if __name__ == "__main__":
    key = jax.random.PRNGKey(0)
    k0, k1, k2, k3 = jax.random.split(key, 4)
    scale = 2.0

    def ref_fn(v):
        return jnp.tanh(v) * scale

    # 1) Module-scale activation (B=2, C=4, H=16, W=16): small-input path.
    x0 = jax.random.normal(k0, (2, 4, 16, 16), dtype=jnp.float32)
    o0 = jax.block_until_ready(tanh_scale(x0, scale))
    assert o0.shape == x0.shape and o0.dtype == x0.dtype
    assert jnp.allclose(o0, ref_fn(x0), atol=1e-5, rtol=1e-5)

    # 2) Larger activation: multi-block 2-D Pallas path (8 x 512 KiB blocks).
    x1 = jax.random.normal(k1, (16, 16, 64, 64), dtype=jnp.float32)
    o1 = jax.block_until_ready(tanh_scale(x1, scale))
    assert o1.shape == x1.shape and o1.dtype == x1.dtype
    assert jnp.allclose(o1, ref_fn(x1), atol=1e-5, rtol=1e-5)

    # 3) bf16 input through the Pallas path (tanh computed in f32 in-kernel).
    x2 = jax.random.normal(k2, (8, 16, 64, 64), dtype=jnp.bfloat16)
    o2 = jax.block_until_ready(tanh_scale(x2, scale))
    assert o2.shape == x2.shape and o2.dtype == jnp.bfloat16
    assert jnp.allclose(o2.astype(jnp.float32), ref_fn(x2.astype(jnp.float32)),
                        atol=2e-2, rtol=2e-2)

    # 4) Ragged size (n % 128 != 0, > 256 KiB): unpadded single-pass path.
    x3 = jax.random.normal(k3, (511, 255), dtype=jnp.float32)
    o3 = jax.block_until_ready(tanh_scale(x3, scale))
    assert o3.shape == x3.shape and o3.dtype == x3.dtype
    assert jnp.allclose(o3, ref_fn(x3), atol=1e-5, rtol=1e-5)

    print("KERNEL_OK")
</pallas_src>

<mosaic_0001>
module attributes {stable_mosaic.version = 11 : i64} {
  func.func @_tanh_scale_kernel(%arg0: i32, %arg1: memref<1xf32, #tpu.memory_space<smem>>, %arg2: memref<32x4096xf32, #tpu.memory_space<vmem>>, %arg3: memref<32x4096xf32, #tpu.memory_space<vmem>>) attributes {dimension_semantics = [#tpu.dimension_semantics<parallel>], iteration_bounds = array<i64: 8>, scalar_prefetch = 1 : i64, scratch_operands = 0 : i64, tpu.core_type = #tpu.core_type<tc>, window_params = [{transform_indices = @transform_0, window_bounds = array<i64: 32, 4096>}, {transform_indices = @transform_1, window_bounds = array<i64: 32, 4096>}]} {
    %c0 = arith.constant 0 : index
    %c0_0 = arith.constant 0 : index
    %0 = vector.load %arg2[%c0, %c0_0] : memref<32x4096xf32, #tpu.memory_space<vmem>>, vector<32x4096xf32>
    %1 = math.tanh %0 : vector<32x4096xf32>
    %c0_1 = arith.constant 0 : index
    %2 = memref.load %arg1[%c0_1] : memref<1xf32, #tpu.memory_space<smem>>
    %3 = vector.broadcast %2 : f32 to vector<32x4096xf32>
    %4 = arith.mulf %1, %3 : vector<32x4096xf32>
    %c0_2 = arith.constant 0 : index
    %c0_3 = arith.constant 0 : index
    %5 = vector.load %arg3[%c0_2, %c0_3] : memref<32x4096xf32, #tpu.memory_space<vmem>>, vector<32x4096xf32>
    tpu.vector_store %arg3[%c0_2, %c0_3], %4 {strides = array<i32>} : memref<32x4096xf32, #tpu.memory_space<vmem>>, vector<32x4096xf32>,
    return
  }
  func.func @transform_0(%arg0: i32, %arg1: memref<1xf32, #tpu.memory_space<smem>>) -> (i32, i32) {
    %c0_i32 = arith.constant 0 : i32
    %c0_i32_0 = arith.constant 0 : i32
    return %arg0, %c0_i32 : i32, i32
  }
  func.func @transform_1(%arg0: i32, %arg1: memref<1xf32, #tpu.memory_space<smem>>) -> (i32, i32) {
    %c0_i32 = arith.constant 0 : i32
    %c0_i32_0 = arith.constant 0 : i32
    return %arg0, %c0_i32 : i32, i32
  }
}

</mosaic_0001>

<bundles_post_ra>
// kernel: tpu_custom_call.1
= control target key start
LH: loop header
LB: loop body
LE: loop exit
PB: predicated region body
PF: predicated region fallthrough
CT: control target
= control target key end

     0   :  { %s1733_s0 = inlined_call_operand.<no memory space> [shape: f32[1], index: 0, kind: input, shape index: {}]   ;;  %s1734_s1 = inlined_call_operand.hbm [shape: f32[256,4096], index: 1, kind: input, shape index: {}]   ;;  %s1735_s2 = inlined_call_operand.hbm [shape: f32[256,4096], index: 2, kind: output, shape index: {}]  }
   0x1   :  { %7 = sst [smem:[#allocation3]] %s1733_s0 }
   0x2   :  { %8 = vsyncpa [#allocation5], 0 }
   0x3   :  { %10 = vsyncpa [#allocation5 + $0x1], 0 }
   0x4   :  { %11 = vsyncpa [#allocation6], 0 }
   0x5   :  { %13 = vsyncpa [#allocation6 + $0x1], 0  ;;  %s1186_s11 = smov 0   ;;  %s1188_s12 = smov 0  }
   0x6   :  { %s1190_s13 = smov 0   ;;  %s1192_s14 = smov 0  }
   0x7 LB: > { %s1207_s0 = sadd.s32 4294967295, %s1160_s14   ;;  %s742_s15 = sadd.s32 4294967294, %s1160_s14   ;;  %s1160_s14 = sphi %s1192_s14, %s1749_s14   ;;  %s1156_s13 = sphi %s1190_s13, %s1748_s13   ;;  %s1152_s12 = sphi %s1188_s12, %s1747_s12   ;;  %s1148_s11 = sphi %s1186_s11, %s1746_s11  }
   0x8   : > { %s1211_s16 = sadd.s32 1, %s1160_s14   ;;  %s26_s17 = sadd.s32 1, %s1156_s13 }
   0x9   : > { %s23_s18 = ssub.s32 %s1160_s14, %s1211_s16  ;;  %p33_p0 = scmp.ne.s32.totalorder %s1156_s13, %s1152_s12 }
   0xa   : > { %p24_p1 = scmp.eq.s32.totalorder %s23_s18, 0  ;;  %p34_p2 = scmp.eq.s32.totalorder %s1160_s14, 0 }
   0xb   : > { %p39_p3 = scmp.ne.s32.totalorder %s1152_s12, %s1148_s11  ;;  %p40_p4 = scmp.eq.s32.totalorder %s1207_s0, 0 }
   0xc   : > { %s1223_s19 = scalar_select %p24_p1, %s1156_s13, %s26_s17  }
   0xd   : > { %p1225_p5 = por %p34_p2, %p33_p0  ;;  %p1229_p6 = por %p40_p4, %p39_p3 }
   0xe   : > { %p63_p7 = scmp.eq.s32.totalorder %s1207_s0, 7  ;;  %p69_p8 = scmp.eq.s32.totalorder %s742_s15, 7 }
   0xf   : > { %s1739_s21 = scalar_select %p1229_p6, 1, 0 }
  0x10   : > { %p774_p9 = scmp.lt.s32.totalorder %s1160_s14, 8  ;;  %p1235_p10 = por %p63_p7, %p33_p0 }
  0x11   : > { %p1239_p11 = por %p69_p8, %p39_p3  ;;  %s89_s24 = sand.u32 1, %s1156_s13  }
  0x12   : > { %s1740_s22 = scalar_select %p1235_p10, 1, 0 }
  0x13   : > { %s1741_s23 = scalar_select %p1239_p11, 1, 0 }
  0x14   : > { %s759_s25 = sshll.u32 %s1160_s14, 14  ;;  %s745_s26 = sshll.u32 %s89_s24, 10 }
  0x15   : > { %s1248_s29 = scalar_lea.hbm %s1734_s1, %s759_s25  ;;  %s93_s30 = scalar_lea.vmem [#allocation4], %s745_s26 }
  0x16   : > { %s101_s3 = sshll.u32 %s93_s30, 4  ;;  %p1252_p12 = pnand %p774_p9, %p1225_p5  ;;  %s1256_s3 = int_to_ptr.vmem [resolvable:$true] %s101_s3 }
  0x17   : > { %s1258_s5 = scalar_lea.sflag [#allocation5], %s89_s24  ;;  %s1068_s6 = scalar_lea.hbm %s1248_s29, 16384 }
  0x18   : > { %p1069_p13 = scmp.ne.s32.totalorder %s1248_s29, %s1068_s6  ;;  %p1070_p0 = pneg %p1252_p12 }
  0x19   : > { %s1073_s9 = scalar_lea.hbm %s1734_s1, 131072  ;;  %p1074_p3 = scmp.lt.s32.totalorder %s1248_s29, %s1734_s1 }
  0x1a   : > { %p1071_p1 = pnand %p1070_p0, %p1069_p13  ;;  %p1075_p4 = scmp.lt.s32.totalorder %s1073_s9, %s1068_s6 }
  0x1c   : > { %p1072_p2 = pneg %p1071_p1  ;;  %p1076_p5 = por %p1075_p4, %p1074_p3 }
  0x1e   : > { %p1077_p7 = pnand %p1076_p5, %p1072_p2 }
  0x20   : > { %1080 = shalt.err (!%p1077_p7)
}
  0x21   : > { %s1081_s17 = scalar_lea.vmem %s1256_s3, 16384  ;;  %s1162_s18 = smov [#allocation4]  }
  0x22   : > { %p1082_p8 = scmp.ne.s32.totalorder %s1256_s3, %s1081_s17  ;;  %s1086_s20 = sshll.u32 %s1162_s18, 4  ;;  %s1087_s20 = int_to_ptr.vmem [resolvable:$false] %s1086_s20 }
  0x23   : > { %s1088_s24 = scalar_lea.vmem %s1087_s20, 32768  ;;  %p1089_p1 = scmp.lt.s32.totalorder %s1256_s3, %s1087_s20 }
  0x24   : > { %p1084_p9 = pnand %p1082_p8, %p1070_p0  ;;  %p1090_p11 = scmp.lt.s32.totalorder %s1088_s24, %s1081_s17 }
  0x26   : > { %p1085_p13 = pneg %p1084_p9  ;;  %p1091_p10 = por %p1090_p11, %p1089_p1 }
  0x28   : > { %p1092_p6 = pnand %p1091_p10, %p1085_p13 }
  0x2a   : > { %1095 = shalt.err (!%p1092_p6)
}
  0x2b   : > { %s1163_s25 = smov 4096   ;;  %s1164_s26 = smov 256  }
  0x2c   : > { %769 = dma.hbm_to_vmem [thread:$0]  (!%p1252_p12), %s1248_s29, 16384, %s1256_s3, %s1258_s5, %s1163_s25, %s1163_s25, %s1164_s26  }
  0x2d   : > { %p749_p0 = scmp.ge.s32.totalorder %s1160_s14, 1  ;;  %p109_p2 = scmp.lt.s32.totalorder %s1160_s14, 9 }
  0x2f   : > { %p110_p3 = pnand %p749_p0, %p109_p2 }
  0x30   : > { %s1282_s27 = sand.u32 (!%p110_p3), 1, %s1152_s12   ;;  %p1743_p6 = scmp.ne.s32.totalorder (!%p110_p3), %s1739_s21, 0 }
  0x31   : > { %113 = sbr.rel (%p110_p3) target bundleno = 213 (0xd5), region = 24  ;;  %s750_s28 = sshll.u32 (!%p110_p3), %s1282_s27, 10 }
  0x32   : > { %s116_s30 = scalar_lea.sflag (!%p110_p3), [#allocation5], %s1282_s27  ;;  %s1288_s6 = scalar_lea.vmem (!%p110_p3), [#allocation4], %s750_s28 }
  0x36   : > { %1139 = dma.done.wait (%p1743_p6), %s116_s30, 16384  }
  0x37   : > { %1141 = vsyncadd (%p1743_p6), %s116_s30, 4294950912  ;;  %v140_v0 = vld [vmem:[%s1288_s6] sm:$0xff]  ;;  %v141_v1 = vld [vmem:[%s1288_s6 + $0x8] sm:$0xff]  ;;  %s396_s21 = sld [smem:[#allocation3]]  ;;  %s1319_s29 = scalar_lea.vmem [#allocation7], %s750_s28 }
  0x38   : > { %v142_v2 = vld [vmem:[%s1288_s6 + $0x10] sm:$0xff]  ;;  %812 = vtanh.f32 %v140_v0  ;;  %v143_v3 = vld [vmem:[%s1288_s6 + $0x18] sm:$0xff]  ;;  %v144_v4 = vld [vmem:[%s1288_s6 + $0x20] sm:$0xff]  ;;  %s761_s3 = sshll.u32 %s1207_s0, 14  ;;  %s669_s4 = sshll.u32 %s1319_s29, 4  ;;  %s1687_s4 = int_to_ptr.vmem [resolvable:$true] %s669_s4 }
  0x39   : > { %814 = vtanh.f32 %v141_v1  ;;  %v145_v5 = vld [vmem:[%s1288_s6 + $0x28] sm:$0xff]  ;;  %v146_v6 = vld [vmem:[%s1288_s6 + $0x30] sm:$0xff]  ;;  %v147_v7 = vld [vmem:[%s1288_s6 + $0x38] sm:$0xff]  ;;  %s1685_s0 = scalar_lea.hbm %s1735_s2, %s761_s3  ;;  %s655_s8 = scalar_lea.sflag [#allocation6], %s1282_s27 }
  0x3a   : > { %816 = vtanh.f32 %v142_v2  ;;  %v148_v8 = vld [vmem:[%s1288_s6 + $0x40] sm:$0xff]  ;;  %v149_v9 = vld [vmem:[%s1288_s6 + $0x48] sm:$0xff]  ;;  %v150_v10 = vld [vmem:[%s1288_s6 + $0x50] sm:$0xff]  ;;  %s1096_s9 = scalar_lea.vmem %s1687_s4, 16384  ;;  %p1744_p11 = scmp.ne.s32.totalorder %s1740_s22, 0 }
  0x3b   : > { %818 = vtanh.f32 %v143_v3  ;;  %v151_v11 = vld [vmem:[%s1288_s6 + $0x58] sm:$0xff]  ;;  %v152_v12 = vld [vmem:[%s1288_s6 + $0x60] sm:$0xff]  ;;  %v153_v13 = vld [vmem:[%s1288_s6 + $0x68] sm:$0xff]  ;;  %p1097_p10 = scmp.ne.s32.totalorder %s1687_s4, %s1096_s9  ;;  %s1165_s10 = smov [#allocation7]  }
  0x3c   : > { %820 = vtanh.f32 %v144_v4  ;;  %v154_v15 = vld [vmem:[%s1288_s6 + $0x70] sm:$0xff]  ;;  %v155_v16 = vld [vmem:[%s1288_s6 + $0x78] sm:$0xff]  ;;  %v156_v18 = vld [vmem:[%s1288_s6 + $0x80] sm:$0xff]  ;;  %s1100_s15 = sshll.u32 %s1165_s10, 4  ;;  %s1101_s15 = int_to_ptr.vmem [resolvable:$false] %s1100_s15 }
  0x3d   : > { %822 = vtanh.f32 %v145_v5  ;;  %v1308_v14 = vstv %s396_s21  ;;  %v157_v21 = vld [vmem:[%s1288_s6 + $0x88] sm:$0xff]  ;;  %v158_v24 = vld [vmem:[%s1288_s6 + $0x90] sm:$0xff]  ;;  %v159_v27 = vld [vmem:[%s1288_s6 + $0x98] sm:$0xff]  ;;  %p1098_p12 = pnand %p1097_p10, %p1744_p11  ;;  %s1102_s17 = scalar_lea.vmem %s1101_s15, 32768 }
  0x3e   : > { %824 = vtanh.f32 %v146_v6  ;;  %v160_v30 = vld [vmem:[%s1288_s6 + $0xa0] sm:$0xff]  ;;  %v161_v33 = vld [vmem:[%s1288_s6 + $0xa8] sm:$0xff]  ;;  %v162_v36 = vld [vmem:[%s1288_s6 + $0xb0] sm:$0xff]  ;;  %p1103_p5 = scmp.lt.s32.totalorder %s1687_s4, %s1101_s15  ;;  %p1104_p7 = scmp.lt.s32.totalorder %s1102_s17, %s1096_s9 }
  0x3f   : > { %826 = vtanh.f32 %v147_v7  ;;  %v163_v39 = vld [vmem:[%s1288_s6 + $0xb8] sm:$0xff]  ;;  %v164_v42 = vld [vmem:[%s1288_s6 + $0xc0] sm:$0xff]  ;;  %v165_v45 = vld [vmem:[%s1288_s6 + $0xc8] sm:$0xff]  ;;  %p1099_p4 = pneg %p1098_p12 }
  0x40   : > { %828 = vtanh.f32 %v148_v8  ;;  %v166_v48 = vld [vmem:[%s1288_s6 + $0xd0] sm:$0xff]  ;;  %v167_v51 = vld [vmem:[%s1288_s6 + $0xd8] sm:$0xff]  ;;  %v168_v54 = vld [vmem:[%s1288_s6 + $0xe0] sm:$0xff]  ;;  %p1105_p8 = por %p1104_p7, %p1103_p5 }
  0x41   : > { %830 = vtanh.f32 %v149_v9  ;;  %v169_v57 = vld [vmem:[%s1288_s6 + $0xe8] sm:$0xff]  ;;  %v170_v60 = vld [vmem:[%s1288_s6 + $0xf0] sm:$0xff]  ;;  %v171_v63 = vld [vmem:[%s1288_s6 + $0xf8] sm:$0xff] }
  0x42   : > { %832 = vtanh.f32 %v150_v10  ;;  %v172_v2 = vld [vmem:[%s1288_s6 + $0x100] sm:$0xff]  ;;  %v173_v5 = vld [vmem:[%s1288_s6 + $0x108] sm:$0xff]  ;;  %v174_v8 = vld [vmem:[%s1288_s6 + $0x110] sm:$0xff]  ;;  %p1106_p9 = pnand %p1105_p8, %p1099_p4 }
  0x43   : > { %834 = vtanh.f32 %v151_v11  ;;  %v175_v11 = vld [vmem:[%s1288_s6 + $0x118] sm:$0xff] }
  0x44   : > { %836 = vtanh.f32 %v152_v12 }
  0x45   : > { %v813_v17 = vpop.eup %812  ;;  %838 = vtanh.f32 %v153_v13 }
  0x46   : > { %v815_v19 = vpop.eup %814  ;;  %v398_v20 = vmul.f32 %v813_v17, %v1308_v14  ;;  %840 = vtanh.f32 %v154_v15  ;;  %v176_v15 = vld [vmem:[%s1288_s6 + $0x120] sm:$0xff] }
  0x47   : > { %v817_v22 = vpop.eup %816  ;;  %v399_v23 = vmul.f32 %v815_v19, %v1308_v14  ;;  %842 = vtanh.f32 %v155_v16 }
  0x48   : > { %v819_v25 = vpop.eup %818  ;;  %526 = vst [vmem:[%s1319_s29] sm:$0xff] %v398_v20  ;;  %v400_v26 = vmul.f32 %v817_v22, %v1308_v14  ;;  %844 = vtanh.f32 %v156_v18  ;;  %v177_v18 = vld [vmem:[%s1288_s6 + $0x128] sm:$0xff] }
  0x49   : > { %v821_v28 = vpop.eup %820  ;;  %527 = vst [vmem:[%s1319_s29 + $0x8] sm:$0xff] %v399_v23  ;;  %v401_v29 = vmul.f32 %v819_v25, %v1308_v14  ;;  %846 = vtanh.f32 %v157_v21  ;;  %v178_v21 = vld [vmem:[%s1288_s6 + $0x130] sm:$0xff] }
  0x4a   : > { %v823_v31 = vpop.eup %822  ;;  %528 = vst [vmem:[%s1319_s29 + $0x10] sm:$0xff] %v400_v26  ;;  %v402_v32 = vmul.f32 %v821_v28, %v1308_v14  ;;  %848 = vtanh.f32 %v158_v24  ;;  %v179_v24 = vld [vmem:[%s1288_s6 + $0x138] sm:$0xff] }
  0x4b   : > { %v825_v34 = vpop.eup %824  ;;  %529 = vst [vmem:[%s1319_s29 + $0x18] sm:$0xff] %v401_v29  ;;  %v403_v35 = vmul.f32 %v823_v31, %v1308_v14  ;;  %850 = vtanh.f32 %v159_v27  ;;  %v180_v27 = vld [vmem:[%s1288_s6 + $0x140] sm:$0xff] }
  0x4c   : > { %v827_v37 = vpop.eup %826  ;;  %530 = vst [vmem:[%s1319_s29 + $0x20] sm:$0xff] %v402_v32  ;;  %v404_v38 = vmul.f32 %v825_v34, %v1308_v14  ;;  %852 = vtanh.f32 %v160_v30  ;;  %v181_v30 = vld [vmem:[%s1288_s6 + $0x148] sm:$0xff] }
  0x4d   : > { %v829_v40 = vpop.eup %828  ;;  %531 = vst [vmem:[%s1319_s29 + $0x28] sm:$0xff] %v403_v35  ;;  %v405_v41 = vmul.f32 %v827_v37, %v1308_v14  ;;  %854 = vtanh.f32 %v161_v33  ;;  %v182_v33 = vld [vmem:[%s1288_s6 + $0x150] sm:$0xff] }
  0x4e   : > { %v831_v43 = vpop.eup %830  ;;  %532 = vst [vmem:[%s1319_s29 + $0x30] sm:$0xff] %v404_v38  ;;  %v406_v44 = vmul.f32 %v829_v40, %v1308_v14  ;;  %856 = vtanh.f32 %v162_v36  ;;  %v183_v36 = vld [vmem:[%s1288_s6 + $0x158] sm:$0xff] }
  0x4f   : > { %v833_v46 = vpop.eup %832  ;;  %533 = vst [vmem:[%s1319_s29 + $0x38] sm:$0xff] %v405_v41  ;;  %v407_v47 = vmul.f32 %v831_v43, %v1308_v14  ;;  %858 = vtanh.f32 %v163_v39  ;;  %v184_v39 = vld [vmem:[%s1288_s6 + $0x160] sm:$0xff] }
  0x50   : > { %v835_v49 = vpop.eup %834  ;;  %534 = vst [vmem:[%s1319_s29 + $0x40] sm:$0xff] %v406_v44  ;;  %v408_v50 = vmul.f32 %v833_v46, %v1308_v14  ;;  %860 = vtanh.f32 %v164_v42  ;;  %v185_v42 = vld [vmem:[%s1288_s6 + $0x168] sm:$0xff] }
  0x51   : > { %v837_v52 = vpop.eup %836  ;;  %535 = vst [vmem:[%s1319_s29 + $0x48] sm:$0xff] %v407_v47  ;;  %v409_v53 = vmul.f32 %v835_v49, %v1308_v14  ;;  %862 = vtanh.f32 %v165_v45  ;;  %v186_v45 = vld [vmem:[%s1288_s6 + $0x170] sm:$0xff] }
  0x52   : > { %v839_v55 = vpop.eup %838  ;;  %536 = vst [vmem:[%s1319_s29 + $0x50] sm:$0xff] %v408_v50  ;;  %v410_v56 = vmul.f32 %v837_v52, %v1308_v14  ;;  %864 = vtanh.f32 %v166_v48  ;;  %v187_v48 = vld [vmem:[%s1288_s6 + $0x178] sm:$0xff] }
  0x53   : > { %v841_v58 = vpop.eup %840  ;;  %537 = vst [vmem:[%s1319_s29 + $0x58] sm:$0xff] %v409_v53  ;;  %v411_v59 = vmul.f32 %v839_v55, %v1308_v14  ;;  %866 = vtanh.f32 %v167_v51  ;;  %v188_v51 = vld [vmem:[%s1288_s6 + $0x180] sm:$0xff] }
  0x54   : > { %v843_v61 = vpop.eup %842  ;;  %538 = vst [vmem:[%s1319_s29 + $0x60] sm:$0xff] %v410_v56  ;;  %v412_v62 = vmul.f32 %v841_v58, %v1308_v14  ;;  %868 = vtanh.f32 %v168_v54  ;;  %v189_v54 = vld [vmem:[%s1288_s6 + $0x188] sm:$0xff] }
  0x55   : > { %v845_v0 = vpop.eup %844  ;;  %539 = vst [vmem:[%s1319_s29 + $0x68] sm:$0xff] %v411_v59  ;;  %v413_v1 = vmul.f32 %v843_v61, %v1308_v14  ;;  %870 = vtanh.f32 %v169_v57  ;;  %v190_v57 = vld [vmem:[%s1288_s6 + $0x190] sm:$0xff] }
  0x56   : > { %v847_v3 = vpop.eup %846  ;;  %540 = vst [vmem:[%s1319_s29 + $0x70] sm:$0xff] %v412_v62  ;;  %v414_v4 = vmul.f32 %v845_v0, %v1308_v14  ;;  %872 = vtanh.f32 %v170_v60  ;;  %v191_v60 = vld [vmem:[%s1288_s6 + $0x198] sm:$0xff] }
  0x57   : > { %v849_v6 = vpop.eup %848  ;;  %541 = vst [vmem:[%s1319_s29 + $0x78] sm:$0xff] %v413_v1  ;;  %v415_v7 = vmul.f32 %v847_v3, %v1308_v14  ;;  %874 = vtanh.f32 %v171_v63  ;;  %v192_v63 = vld [vmem:[%s1288_s6 + $0x1a0] sm:$0xff] }
  0x58   : > { %v851_v9 = vpop.eup %850  ;;  %542 = vst [vmem:[%s1319_s29 + $0x80] sm:$0xff] %v414_v4  ;;  %v416_v10 = vmul.f32 %v849_v6, %v1308_v14  ;;  %876 = vtanh.f32 %v172_v2  ;;  %v193_v2 = vld [vmem:[%s1288_s6 + $0x1a8] sm:$0xff] }
  0x59   : > { %v853_v12 = vpop.eup %852  ;;  %543 = vst [vmem:[%s1319_s29 + $0x88] sm:$0xff] %v415_v7  ;;  %v417_v13 = vmul.f32 %v851_v9, %v1308_v14  ;;  %878 = vtanh.f32 %v173_v5  ;;  %v194_v5 = vld [vmem:[%s1288_s6 + $0x1b0] sm:$0xff] }
  0x5a   : > { %v855_v16 = vpop.eup %854  ;;  %544 = vst [vmem:[%s1319_s29 + $0x90] sm:$0xff] %v416_v10  ;;  %v418_v17 = vmul.f32 %v853_v12, %v1308_v14  ;;  %880 = vtanh.f32 %v174_v8  ;;  %v195_v8 = vld [vmem:[%s1288_s6 + $0x1b8] sm:$0xff] }
  0x5b   : > { %v857_v19 = vpop.eup %856  ;;  %545 = vst [vmem:[%s1319_s29 + $0x98] sm:$0xff] %v417_v13  ;;  %v419_v20 = vmul.f32 %v855_v16, %v1308_v14  ;;  %882 = vtanh.f32 %v175_v11  ;;  %v196_v11 = vld [vmem:[%s1288_s6 + $0x1c0] sm:$0xff] }
  0x5c   : > { %v859_v22 = vpop.eup %858  ;;  %546 = vst [vmem:[%s1319_s29 + $0xa0] sm:$0xff] %v418_v17  ;;  %v420_v23 = vmul.f32 %v857_v19, %v1308_v14  ;;  %884 = vtanh.f32 %v176_v15  ;;  %v197_v15 = vld [vmem:[%s1288_s6 + $0x1c8] sm:$0xff] }
  0x5d   : > { %v861_v25 = vpop.eup %860  ;;  %547 = vst [vmem:[%s1319_s29 + $0xa8] sm:$0xff] %v419_v20  ;;  %v421_v26 = vmul.f32 %v859_v22, %v1308_v14  ;;  %886 = vtanh.f32 %v177_v18  ;;  %v198_v18 = vld [vmem:[%s1288_s6 + $0x1d0] sm:$0xff] }
  0x5e   : > { %v863_v28 = vpop.eup %862  ;;  %548 = vst [vmem:[%s1319_s29 + $0xb0] sm:$0xff] %v420_v23  ;;  %v422_v29 = vmul.f32 %v861_v25, %v1308_v14  ;;  %888 = vtanh.f32 %v178_v21  ;;  %v199_v21 = vld [vmem:[%s1288_s6 + $0x1d8] sm:$0xff] }
  0x5f   : > { %v865_v31 = vpop.eup %864  ;;  %549 = vst [vmem:[%s1319_s29 + $0xb8] sm:$0xff] %v421_v26  ;;  %v423_v32 = vmul.f32 %v863_v28, %v1308_v14  ;;  %890 = vtanh.f32 %v179_v24  ;;  %v200_v24 = vld [vmem:[%s1288_s6 + $0x1e0] sm:$0xff] }
  0x60   : > { %v867_v34 = vpop.eup %866  ;;  %550 = vst [vmem:[%s1319_s29 + $0xc0] sm:$0xff] %v422_v29  ;;  %v424_v35 = vmul.f32 %v865_v31, %v1308_v14  ;;  %892 = vtanh.f32 %v180_v27  ;;  %v201_v27 = vld [vmem:[%s1288_s6 + $0x1e8] sm:$0xff] }
  0x61   : > { %v869_v37 = vpop.eup %868  ;;  %551 = vst [vmem:[%s1319_s29 + $0xc8] sm:$0xff] %v423_v32  ;;  %v425_v38 = vmul.f32 %v867_v34, %v1308_v14  ;;  %894 = vtanh.f32 %v181_v30  ;;  %v202_v30 = vld [vmem:[%s1288_s6 + $0x1f0] sm:$0xff] }
  0x62   : > { %v871_v40 = vpop.eup %870  ;;  %552 = vst [vmem:[%s1319_s29 + $0xd0] sm:$0xff] %v424_v35  ;;  %v426_v41 = vmul.f32 %v869_v37, %v1308_v14  ;;  %896 = vtanh.f32 %v182_v33  ;;  %v203_v33 = vld [vmem:[%s1288_s6 + $0x1f8] sm:$0xff] }
  0x63   : > { %v873_v43 = vpop.eup %872  ;;  %553 = vst [vmem:[%s1319_s29 + $0xd8] sm:$0xff] %v425_v38  ;;  %v427_v44 = vmul.f32 %v871_v40, %v1308_v14  ;;  %898 = vtanh.f32 %v183_v36  ;;  %v204_v36 = vld [vmem:[%s1288_s6 + $0x200] sm:$0xff] }
  0x64   : > { %v875_v46 = vpop.eup %874  ;;  %554 = vst [vmem:[%s1319_s29 + $0xe0] sm:$0xff] %v426_v41  ;;  %v428_v47 = vmul.f32 %v873_v43, %v1308_v14  ;;  %900 = vtanh.f32 %v184_v39  ;;  %v205_v39 = vld [vmem:[%s1288_s6 + $0x208] sm:$0xff] }
  0x65   : > { %v877_v49 = vpop.eup %876  ;;  %555 = vst [vmem:[%s1319_s29 + $0xe8] sm:$0xff] %v427_v44  ;;  %v429_v50 = vmul.f32 %v875_v46, %v1308_v14  ;;  %902 = vtanh.f32 %v185_v42  ;;  %v206_v42 = vld [vmem:[%s1288_s6 + $0x210] sm:$0xff] }
  0x66   : > { %v879_v52 = vpop.eup %878  ;;  %556 = vst [vmem:[%s1319_s29 + $0xf0] sm:$0xff] %v428_v47  ;;  %v430_v53 = vmul.f32 %v877_v49, %v1308_v14  ;;  %904 = vtanh.f32 %v186_v45  ;;  %v207_v45 = vld [vmem:[%s1288_s6 + $0x218] sm:$0xff] }
  0x67   : > { %v881_v55 = vpop.eup %880  ;;  %557 = vst [vmem:[%s1319_s29 + $0xf8] sm:$0xff] %v429_v50  ;;  %v431_v56 = vmul.f32 %v879_v52, %v1308_v14  ;;  %906 = vtanh.f32 %v187_v48  ;;  %v208_v48 = vld [vmem:[%s1288_s6 + $0x220] sm:$0xff] }
  0x68   : > { %v883_v58 = vpop.eup %882  ;;  %558 = vst [vmem:[%s1319_s29 + $0x100] sm:$0xff] %v430_v53  ;;  %v432_v59 = vmul.f32 %v881_v55, %v1308_v14  ;;  %908 = vtanh.f32 %v188_v51  ;;  %v209_v51 = vld [vmem:[%s1288_s6 + $0x228] sm:$0xff] }
  0x69   : > { %v885_v61 = vpop.eup %884  ;;  %559 = vst [vmem:[%s1319_s29 + $0x108] sm:$0xff] %v431_v56  ;;  %v433_v62 = vmul.f32 %v883_v58, %v1308_v14  ;;  %910 = vtanh.f32 %v189_v54  ;;  %v210_v54 = vld [vmem:[%s1288_s6 + $0x230] sm:$0xff] }
  0x6a   : > { %v887_v0 = vpop.eup %886  ;;  %560 = vst [vmem:[%s1319_s29 + $0x110] sm:$0xff] %v432_v59  ;;  %v434_v1 = vmul.f32 %v885_v61, %v1308_v14  ;;  %912 = vtanh.f32 %v190_v57  ;;  %v211_v57 = vld [vmem:[%s1288_s6 + $0x238] sm:$0xff] }
  0x6b   : > { %v889_v3 = vpop.eup %888  ;;  %561 = vst [vmem:[%s1319_s29 + $0x118] sm:$0xff] %v433_v62  ;;  %v435_v4 = vmul.f32 %v887_v0, %v1308_v14  ;;  %914 = vtanh.f32 %v191_v60  ;;  %v212_v60 = vld [vmem:[%s1288_s6 + $0x240] sm:$0xff] }
  0x6c   : > { %v891_v6 = vpop.eup %890  ;;  %562 = vst [vmem:[%s1319_s29 + $0x120] sm:$0xff] %v434_v1  ;;  %v436_v7 = vmul.f32 %v889_v3, %v1308_v14  ;;  %916 = vtanh.f32 %v192_v63  ;;  %v213_v63 = vld [vmem:[%s1288_s6 + $0x248] sm:$0xff] }
  0x6d   : > { %v893_v9 = vpop.eup %892  ;;  %563 = vst [vmem:[%s1319_s29 + $0x128] sm:$0xff] %v435_v4  ;;  %v437_v10 = vmul.f32 %v891_v6, %v1308_v14  ;;  %918 = vtanh.f32 %v193_v2  ;;  %v214_v2 = vld [vmem:[%s1288_s6 + $0x250] sm:$0xff] }
  0x6e   : > { %v895_v12 = vpop.eup %894  ;;  %564 = vst [vmem:[%s1319_s29 + $0x130] sm:$0xff] %v436_v7  ;;  %v438_v13 = vmul.f32 %v893_v9, %v1308_v14  ;;  %920 = vtanh.f32 %v194_v5  ;;  %v215_v5 = vld [vmem:[%s1288_s6 + $0x258] sm:$0xff] }
  0x6f   : > { %v897_v16 = vpop.eup %896  ;;  %565 = vst [vmem:[%s1319_s29 + $0x138] sm:$0xff] %v437_v10  ;;  %v439_v17 = vmul.f32 %v895_v12, %v1308_v14  ;;  %922 = vtanh.f32 %v195_v8  ;;  %v216_v8 = vld [vmem:[%s1288_s6 + $0x260] sm:$0xff] }
  0x70   : > { %v899_v19 = vpop.eup %898  ;;  %566 = vst [vmem:[%s1319_s29 + $0x140] sm:$0xff] %v438_v13  ;;  %v440_v20 = vmul.f32 %v897_v16, %v1308_v14  ;;  %924 = vtanh.f32 %v196_v11  ;;  %v217_v11 = vld [vmem:[%s1288_s6 + $0x268] sm:$0xff] }
  0x71   : > { %v901_v22 = vpop.eup %900  ;;  %567 = vst [vmem:[%s1319_s29 + $0x148] sm:$0xff] %v439_v17  ;;  %v441_v23 = vmul.f32 %v899_v19, %v1308_v14  ;;  %926 = vtanh.f32 %v197_v15  ;;  %v218_v15 = vld [vmem:[%s1288_s6 + $0x270] sm:$0xff] }
  0x72   : > { %v903_v25 = vpop.eup %902  ;;  %568 = vst [vmem:[%s1319_s29 + $0x150] sm:$0xff] %v440_v20  ;;  %v442_v26 = vmul.f32 %v901_v22, %v1308_v14  ;;  %928 = vtanh.f32 %v198_v18  ;;  %v219_v18 = vld [vmem:[%s1288_s6 + $0x278] sm:$0xff] }
  0x73   : > { %v905_v28 = vpop.eup %904  ;;  %569 = vst [vmem:[%s1319_s29 + $0x158] sm:$0xff] %v441_v23  ;;  %v443_v29 = vmul.f32 %v903_v25, %v1308_v14  ;;  %930 = vtanh.f32 %v199_v21  ;;  %v220_v21 = vld [vmem:[%s1288_s6 + $0x280] sm:$0xff] }
  0x74   : > { %v907_v31 = vpop.eup %906  ;;  %570 = vst [vmem:[%s1319_s29 + $0x160] sm:$0xff] %v442_v26  ;;  %v444_v32 = vmul.f32 %v905_v28, %v1308_v14  ;;  %932 = vtanh.f32 %v200_v24  ;;  %v221_v24 = vld [vmem:[%s1288_s6 + $0x288] sm:$0xff] }
  0x75   : > { %v909_v34 = vpop.eup %908  ;;  %571 = vst [vmem:[%s1319_s29 + $0x168] sm:$0xff] %v443_v29  ;;  %v445_v35 = vmul.f32 %v907_v31, %v1308_v14  ;;  %934 = vtanh.f32 %v201_v27  ;;  %v222_v27 = vld [vmem:[%s1288_s6 + $0x290] sm:$0xff] }
  0x76   : > { %v911_v37 = vpop.eup %910  ;;  %572 = vst [vmem:[%s1319_s29 + $0x170] sm:$0xff] %v444_v32  ;;  %v446_v38 = vmul.f32 %v909_v34, %v1308_v14  ;;  %936 = vtanh.f32 %v202_v30  ;;  %v223_v30 = vld [vmem:[%s1288_s6 + $0x298] sm:$0xff] }
  0x77   : > { %v913_v40 = vpop.eup %912  ;;  %573 = vst [vmem:[%s1319_s29 + $0x178] sm:$0xff] %v445_v35  ;;  %v447_v41 = vmul.f32 %v911_v37, %v1308_v14  ;;  %938 = vtanh.f32 %v203_v33  ;;  %v224_v33 = vld [vmem:[%s1288_s6 + $0x2a0] sm:$0xff] }
  0x78   : > { %v915_v43 = vpop.eup %914  ;;  %574 = vst [vmem:[%s1319_s29 + $0x180] sm:$0xff] %v446_v38  ;;  %v448_v44 = vmul.f32 %v913_v40, %v1308_v14  ;;  %940 = vtanh.f32 %v204_v36  ;;  %v225_v36 = vld [vmem:[%s1288_s6 + $0x2a8] sm:$0xff] }
  0x79   : > { %v917_v46 = vpop.eup %916  ;;  %575 = vst [vmem:[%s1319_s29 + $0x188] sm:$0xff] %v447_v41  ;;  %v449_v47 = vmul.f32 %v915_v43, %v1308_v14  ;;  %942 = vtanh.f32 %v205_v39  ;;  %v226_v39 = vld [vmem:[%s1288_s6 + $0x2b0] sm:$0xff] }
  0x7a   : > { %v919_v49 = vpop.eup %918  ;;  %576 = vst [vmem:[%s1319_s29 + $0x190] sm:$0xff] %v448_v44  ;;  %v450_v50 = vmul.f32 %v917_v46, %v1308_v14  ;;  %944 = vtanh.f32 %v206_v42  ;;  %v227_v42 = vld [vmem:[%s1288_s6 + $0x2b8] sm:$0xff] }
  0x7b   : > { %v921_v52 = vpop.eup %920  ;;  %577 = vst [vmem:[%s1319_s29 + $0x198] sm:$0xff] %v449_v47  ;;  %v451_v53 = vmul.f32 %v919_v49, %v1308_v14  ;;  %946 = vtanh.f32 %v207_v45  ;;  %v228_v45 = vld [vmem:[%s1288_s6 + $0x2c0] sm:$0xff] }
  0x7c   : > { %v923_v55 = vpop.eup %922  ;;  %578 = vst [vmem:[%s1319_s29 + $0x1a0] sm:$0xff] %v450_v50  ;;  %v452_v56 = vmul.f32 %v921_v52, %v1308_v14  ;;  %948 = vtanh.f32 %v208_v48  ;;  %v229_v48 = vld [vmem:[%s1288_s6 + $0x2c8] sm:$0xff] }
  0x7d   : > { %v925_v58 = vpop.eup %924  ;;  %579 = vst [vmem:[%s1319_s29 + $0x1a8] sm:$0xff] %v451_v53  ;;  %v453_v59 = vmul.f32 %v923_v55, %v1308_v14  ;;  %950 = vtanh.f32 %v209_v51  ;;  %v230_v51 = vld [vmem:[%s1288_s6 + $0x2d0] sm:$0xff] }
  0x7e   : > { %v927_v61 = vpop.eup %926  ;;  %580 = vst [vmem:[%s1319_s29 + $0x1b0] sm:$0xff] %v452_v56  ;;  %v454_v62 = vmul.f32 %v925_v58, %v1308_v14  ;;  %952 = vtanh.f32 %v210_v54  ;;  %v231_v54 = vld [vmem:[%s1288_s6 + $0x2d8] sm:$0xff] }
  0x7f   : > { %v929_v0 = vpop.eup %928  ;;  %581 = vst [vmem:[%s1319_s29 + $0x1b8] sm:$0xff] %v453_v59  ;;  %v455_v1 = vmul.f32 %v927_v61, %v1308_v14  ;;  %954 = vtanh.f32 %v211_v57  ;;  %v232_v57 = vld [vmem:[%s1288_s6 + $0x2e0] sm:$0xff] }
  0x80   : > { %v931_v3 = vpop.eup %930  ;;  %582 = vst [vmem:[%s1319_s29 + $0x1c0] sm:$0xff] %v454_v62  ;;  %v456_v4 = vmul.f32 %v929_v0, %v1308_v14  ;;  %956 = vtanh.f32 %v212_v60  ;;  %v233_v60 = vld [vmem:[%s1288_s6 + $0x2e8] sm:$0xff] }
  0x81   : > { %v933_v6 = vpop.eup %932  ;;  %583 = vst [vmem:[%s1319_s29 + $0x1c8] sm:$0xff] %v455_v1  ;;  %v457_v7 = vmul.f32 %v931_v3, %v1308_v14  ;;  %958 = vtanh.f32 %v213_v63  ;;  %v234_v63 = vld [vmem:[%s1288_s6 + $0x2f0] sm:$0xff] }
  0x82   : > { %v935_v9 = vpop.eup %934  ;;  %584 = vst [vmem:[%s1319_s29 + $0x1d0] sm:$0xff] %v456_v4  ;;  %v458_v10 = vmul.f32 %v933_v6, %v1308_v14  ;;  %960 = vtanh.f32 %v214_v2  ;;  %v235_v2 = vld [vmem:[%s1288_s6 + $0x2f8] sm:$0xff] }
  0x83   : > { %v937_v12 = vpop.eup %936  ;;  %585 = vst [vmem:[%s1319_s29 + $0x1d8] sm:$0xff] %v457_v7  ;;  %v459_v13 = vmul.f32 %v935_v9, %v1308_v14  ;;  %962 = vtanh.f32 %v215_v5  ;;  %v236_v5 = vld [vmem:[%s1288_s6 + $0x300] sm:$0xff] }
  0x84   : > { %v939_v16 = vpop.eup %938  ;;  %586 = vst [vmem:[%s1319_s29 + $0x1e0] sm:$0xff] %v458_v10  ;;  %v460_v17 = vmul.f32 %v937_v12, %v1308_v14  ;;  %964 = vtanh.f32 %v216_v8  ;;  %v237_v8 = vld [vmem:[%s1288_s6 + $0x308] sm:$0xff] }
  0x85   : > { %v941_v19 = vpop.eup %940  ;;  %587 = vst [vmem:[%s1319_s29 + $0x1e8] sm:$0xff] %v459_v13  ;;  %v461_v20 = vmul.f32 %v939_v16, %v1308_v14  ;;  %966 = vtanh.f32 %v217_v11  ;;  %v238_v11 = vld [vmem:[%s1288_s6 + $0x310] sm:$0xff] }
  0x86   : > { %v943_v22 = vpop.eup %942  ;;  %588 = vst [vmem:[%s1319_s29 + $0x1f0] sm:$0xff] %v460_v17  ;;  %v462_v23 = vmul.f32 %v941_v19, %v1308_v14  ;;  %968 = vtanh.f32 %v218_v15  ;;  %v239_v15 = vld [vmem:[%s1288_s6 + $0x318] sm:$0xff] }
  0x87   : > { %v945_v25 = vpop.eup %944  ;;  %589 = vst [vmem:[%s1319_s29 + $0x1f8] sm:$0xff] %v461_v20  ;;  %v463_v26 = vmul.f32 %v943_v22, %v1308_v14  ;;  %970 = vtanh.f32 %v219_v18  ;;  %v240_v18 = vld [vmem:[%s1288_s6 + $0x320] sm:$0xff] }
  0x88   : > { %v947_v28 = vpop.eup %946  ;;  %590 = vst [vmem:[%s1319_s29 + $0x200] sm:$0xff] %v462_v23  ;;  %v464_v29 = vmul.f32 %v945_v25, %v1308_v14  ;;  %972 = vtanh.f32 %v220_v21  ;;  %v241_v21 = vld [vmem:[%s1288_s6 + $0x328] sm:$0xff] }
  0x89   : > { %v949_v31 = vpop.eup %948  ;;  %591 = vst [vmem:[%s1319_s29 + $0x208] sm:$0xff] %v463_v26  ;;  %v465_v32 = vmul.f32 %v947_v28, %v1308_v14  ;;  %974 = vtanh.f32 %v221_v24  ;;  %v242_v24 = vld [vmem:[%s1288_s6 + $0x330] sm:$0xff] }
  0x8a   : > { %v951_v34 = vpop.eup %950  ;;  %592 = vst [vmem:[%s1319_s29 + $0x210] sm:$0xff] %v464_v29  ;;  %v466_v35 = vmul.f32 %v949_v31, %v1308_v14  ;;  %976 = vtanh.f32 %v222_v27  ;;  %v243_v27 = vld [vmem:[%s1288_s6 + $0x338] sm:$0xff] }
  0x8b   : > { %v953_v37 = vpop.eup %952  ;;  %593 = vst [vmem:[%s1319_s29 + $0x218] sm:$0xff] %v465_v32  ;;  %v467_v38 = vmul.f32 %v951_v34, %v1308_v14  ;;  %978 = vtanh.f32 %v223_v30  ;;  %v244_v30 = vld [vmem:[%s1288_s6 + $0x340] sm:$0xff] }
  0x8c   : > { %v955_v40 = vpop.eup %954  ;;  %594 = vst [vmem:[%s1319_s29 + $0x220] sm:$0xff] %v466_v35  ;;  %v468_v41 = vmul.f32 %v953_v37, %v1308_v14  ;;  %980 = vtanh.f32 %v224_v33  ;;  %v245_v33 = vld [vmem:[%s1288_s6 + $0x348] sm:$0xff] }
  0x8d   : > { %v957_v43 = vpop.eup %956  ;;  %595 = vst [vmem:[%s1319_s29 + $0x228] sm:$0xff] %v467_v38  ;;  %v469_v44 = vmul.f32 %v955_v40, %v1308_v14  ;;  %982 = vtanh.f32 %v225_v36  ;;  %v246_v36 = vld [vmem:[%s1288_s6 + $0x350] sm:$0xff] }
  0x8e   : > { %v959_v46 = vpop.eup %958  ;;  %596 = vst [vmem:[%s1319_s29 + $0x230] sm:$0xff] %v468_v41  ;;  %v470_v47 = vmul.f32 %v957_v43, %v1308_v14  ;;  %984 = vtanh.f32 %v226_v39  ;;  %v247_v39 = vld [vmem:[%s1288_s6 + $0x358] sm:$0xff] }
  0x8f   : > { %v961_v49 = vpop.eup %960  ;;  %597 = vst [vmem:[%s1319_s29 + $0x238] sm:$0xff] %v469_v44  ;;  %v471_v50 = vmul.f32 %v959_v46, %v1308_v14  ;;  %986 = vtanh.f32 %v227_v42  ;;  %v248_v42 = vld [vmem:[%s1288_s6 + $0x360] sm:$0xff] }
  0x90   : > { %v963_v52 = vpop.eup %962  ;;  %598 = vst [vmem:[%s1319_s29 + $0x240] sm:$0xff] %v470_v47  ;;  %v472_v53 = vmul.f32 %v961_v49, %v1308_v14  ;;  %988 = vtanh.f32 %v228_v45  ;;  %v249_v45 = vld [vmem:[%s1288_s6 + $0x368] sm:$0xff] }
  0x91   : > { %v965_v55 = vpop.eup %964  ;;  %599 = vst [vmem:[%s1319_s29 + $0x248] sm:$0xff] %v471_v50  ;;  %v473_v56 = vmul.f32 %v963_v52, %v1308_v14  ;;  %990 = vtanh.f32 %v229_v48  ;;  %v250_v48 = vld [vmem:[%s1288_s6 + $0x370] sm:$0xff] }
  0x92   : > { %v967_v58 = vpop.eup %966  ;;  %600 = vst [vmem:[%s1319_s29 + $0x250] sm:$0xff] %v472_v53  ;;  %v474_v59 = vmul.f32 %v965_v55, %v1308_v14  ;;  %992 = vtanh.f32 %v230_v51  ;;  %v251_v51 = vld [vmem:[%s1288_s6 + $0x378] sm:$0xff] }
  0x93   : > { %v969_v61 = vpop.eup %968  ;;  %601 = vst [vmem:[%s1319_s29 + $0x258] sm:$0xff] %v473_v56  ;;  %v475_v62 = vmul.f32 %v967_v58, %v1308_v14  ;;  %994 = vtanh.f32 %v231_v54  ;;  %v252_v54 = vld [vmem:[%s1288_s6 + $0x380] sm:$0xff] }
  0x94   : > { %v971_v0 = vpop.eup %970  ;;  %602 = vst [vmem:[%s1319_s29 + $0x260] sm:$0xff] %v474_v59  ;;  %v476_v1 = vmul.f32 %v969_v61, %v1308_v14  ;;  %996 = vtanh.f32 %v232_v57  ;;  %v253_v57 = vld [vmem:[%s1288_s6 + $0x388] sm:$0xff] }
  0x95   : > { %v973_v3 = vpop.eup %972  ;;  %603 = vst [vmem:[%s1319_s29 + $0x268] sm:$0xff] %v475_v62  ;;  %v477_v4 = vmul.f32 %v971_v0, %v1308_v14  ;;  %998 = vtanh.f32 %v233_v60  ;;  %v254_v60 = vld [vmem:[%s1288_s6 + $0x390] sm:$0xff] }
  0x96   : > { %v975_v6 = vpop.eup %974  ;;  %604 = vst [vmem:[%s1319_s29 + $0x270] sm:$0xff] %v476_v1  ;;  %v478_v7 = vmul.f32 %v973_v3, %v1308_v14  ;;  %1000 = vtanh.f32 %v234_v63  ;;  %v255_v63 = vld [vmem:[%s1288_s6 + $0x398] sm:$0xff] }
  0x97   : > { %v977_v9 = vpop.eup %976  ;;  %605 = vst [vmem:[%s1319_s29 + $0x278] sm:$0xff] %v477_v4  ;;  %v479_v10 = vmul.f32 %v975_v6, %v1308_v14  ;;  %1002 = vtanh.f32 %v235_v2  ;;  %v256_v2 = vld [vmem:[%s1288_s6 + $0x3a0] sm:$0xff] }
  0x98   : > { %v979_v12 = vpop.eup %978  ;;  %606 = vst [vmem:[%s1319_s29 + $0x280] sm:$0xff] %v478_v7  ;;  %v480_v13 = vmul.f32 %v977_v9, %v1308_v14  ;;  %1004 = vtanh.f32 %v236_v5  ;;  %v257_v5 = vld [vmem:[%s1288_s6 + $0x3a8] sm:$0xff] }
  0x99   : > { %v981_v16 = vpop.eup %980  ;;  %607 = vst [vmem:[%s1319_s29 + $0x288] sm:$0xff] %v479_v10  ;;  %v481_v17 = vmul.f32 %v979_v12, %v1308_v14  ;;  %1006 = vtanh.f32 %v237_v8  ;;  %v258_v8 = vld [vmem:[%s1288_s6 + $0x3b0] sm:$0xff] }
  0x9a   : > { %v983_v19 = vpop.eup %982  ;;  %608 = vst [vmem:[%s1319_s29 + $0x290] sm:$0xff] %v480_v13  ;;  %v482_v20 = vmul.f32 %v981_v16, %v1308_v14  ;;  %1008 = vtanh.f32 %v238_v11  ;;  %v259_v11 = vld [vmem:[%s1288_s6 + $0x3b8] sm:$0xff] }
  0x9b   : > { %v985_v22 = vpop.eup %984  ;;  %609 = vst [vmem:[%s1319_s29 + $0x298] sm:$0xff] %v481_v17  ;;  %v483_v23 = vmul.f32 %v983_v19, %v1308_v14  ;;  %1010 = vtanh.f32 %v239_v15  ;;  %v260_v15 = vld [vmem:[%s1288_s6 + $0x3c0] sm:$0xff] }
  0x9c   : > { %v987_v25 = vpop.eup %986  ;;  %610 = vst [vmem:[%s1319_s29 + $0x2a0] sm:$0xff] %v482_v20  ;;  %v484_v26 = vmul.f32 %v985_v22, %v1308_v14  ;;  %1012 = vtanh.f32 %v240_v18  ;;  %v261_v18 = vld [vmem:[%s1288_s6 + $0x3c8] sm:$0xff] }
  0x9d   : > { %v989_v28 = vpop.eup %988  ;;  %611 = vst [vmem:[%s1319_s29 + $0x2a8] sm:$0xff] %v483_v23  ;;  %v485_v29 = vmul.f32 %v987_v25, %v1308_v14  ;;  %1014 = vtanh.f32 %v241_v21  ;;  %v262_v21 = vld [vmem:[%s1288_s6 + $0x3d0] sm:$0xff] }
  0x9e   : > { %v991_v31 = vpop.eup %990  ;;  %612 = vst [vmem:[%s1319_s29 + $0x2b0] sm:$0xff] %v484_v26  ;;  %v486_v32 = vmul.f32 %v989_v28, %v1308_v14  ;;  %1016 = vtanh.f32 %v242_v24  ;;  %v263_v24 = vld [vmem:[%s1288_s6 + $0x3d8] sm:$0xff] }
  0x9f   : > { %v993_v34 = vpop.eup %992  ;;  %613 = vst [vmem:[%s1319_s29 + $0x2b8] sm:$0xff] %v485_v29  ;;  %v487_v35 = vmul.f32 %v991_v31, %v1308_v14  ;;  %1018 = vtanh.f32 %v243_v27  ;;  %v264_v27 = vld [vmem:[%s1288_s6 + $0x3e0] sm:$0xff] }
  0xa0   : > { %v995_v37 = vpop.eup %994  ;;  %614 = vst [vmem:[%s1319_s29 + $0x2c0] sm:$0xff] %v486_v32  ;;  %v488_v38 = vmul.f32 %v993_v34, %v1308_v14  ;;  %1020 = vtanh.f32 %v244_v30  ;;  %v265_v30 = vld [vmem:[%s1288_s6 + $0x3e8] sm:$0xff] }
  0xa1   : > { %v997_v40 = vpop.eup %996  ;;  %615 = vst [vmem:[%s1319_s29 + $0x2c8] sm:$0xff] %v487_v35  ;;  %v489_v41 = vmul.f32 %v995_v37, %v1308_v14  ;;  %1022 = vtanh.f32 %v245_v33  ;;  %v266_v33 = vld [vmem:[%s1288_s6 + $0x3f0] sm:$0xff] }
  0xa2   : > { %v999_v43 = vpop.eup %998  ;;  %616 = vst [vmem:[%s1319_s29 + $0x2d0] sm:$0xff] %v488_v38  ;;  %v490_v44 = vmul.f32 %v997_v40, %v1308_v14  ;;  %1024 = vtanh.f32 %v246_v36  ;;  %v267_v36 = vld [vmem:[%s1288_s6 + $0x3f8] sm:$0xff] }
  0xa3   : > { %v1001_v46 = vpop.eup %1000  ;;  %617 = vst [vmem:[%s1319_s29 + $0x2d8] sm:$0xff] %v489_v41  ;;  %v491_v47 = vmul.f32 %v999_v43, %v1308_v14  ;;  %1026 = vtanh.f32 %v247_v39 }
  0xa4   : > { %v1003_v49 = vpop.eup %1002  ;;  %618 = vst [vmem:[%s1319_s29 + $0x2e0] sm:$0xff] %v490_v44  ;;  %v492_v50 = vmul.f32 %v1001_v46, %v1308_v14  ;;  %1028 = vtanh.f32 %v248_v42 }
  0xa5   : > { %v1005_v52 = vpop.eup %1004  ;;  %619 = vst [vmem:[%s1319_s29 + $0x2e8] sm:$0xff] %v491_v47  ;;  %v493_v53 = vmul.f32 %v1003_v49, %v1308_v14  ;;  %1030 = vtanh.f32 %v249_v45 }
  0xa6   : > { %v1007_v55 = vpop.eup %1006  ;;  %620 = vst [vmem:[%s1319_s29 + $0x2f0] sm:$0xff] %v492_v50  ;;  %v494_v56 = vmul.f32 %v1005_v52, %v1308_v14  ;;  %1032 = vtanh.f32 %v250_v48 }
  0xa7   : > { %v1009_v58 = vpop.eup %1008  ;;  %621 = vst [vmem:[%s1319_s29 + $0x2f8] sm:$0xff] %v493_v53  ;;  %v495_v59 = vmul.f32 %v1007_v55, %v1308_v14  ;;  %1034 = vtanh.f32 %v251_v51 }
  0xa8   : > { %v1011_v61 = vpop.eup %1010  ;;  %622 = vst [vmem:[%s1319_s29 + $0x300] sm:$0xff] %v494_v56  ;;  %v496_v62 = vmul.f32 %v1009_v58, %v1308_v14  ;;  %1036 = vtanh.f32 %v252_v54 }
  0xa9   : > { %v1013_v0 = vpop.eup %1012  ;;  %623 = vst [vmem:[%s1319_s29 + $0x308] sm:$0xff] %v495_v59  ;;  %v497_v1 = vmul.f32 %v1011_v61, %v1308_v14  ;;  %1038 = vtanh.f32 %v253_v57 }
  0xaa   : > { %v1015_v3 = vpop.eup %1014  ;;  %624 = vst [vmem:[%s1319_s29 + $0x310] sm:$0xff] %v496_v62  ;;  %v498_v4 = vmul.f32 %v1013_v0, %v1308_v14  ;;  %1040 = vtanh.f32 %v254_v60 }
  0xab   : > { %v1017_v6 = vpop.eup %1016  ;;  %625 = vst [vmem:[%s1319_s29 + $0x318] sm:$0xff] %v497_v1  ;;  %v499_v7 = vmul.f32 %v1015_v3, %v1308_v14  ;;  %1042 = vtanh.f32 %v255_v63 }
  0xac   : > { %v1019_v9 = vpop.eup %1018  ;;  %626 = vst [vmem:[%s1319_s29 + $0x320] sm:$0xff] %v498_v4  ;;  %v500_v10 = vmul.f32 %v1017_v6, %v1308_v14  ;;  %1044 = vtanh.f32 %v256_v2 }
  0xad   : > { %v1021_v12 = vpop.eup %1020  ;;  %627 = vst [vmem:[%s1319_s29 + $0x328] sm:$0xff] %v499_v7  ;;  %v501_v13 = vmul.f32 %v1019_v9, %v1308_v14  ;;  %1046 = vtanh.f32 %v257_v5 }
  0xae   : > { %v1023_v16 = vpop.eup %1022  ;;  %628 = vst [vmem:[%s1319_s29 + $0x330] sm:$0xff] %v500_v10  ;;  %v502_v17 = vmul.f32 %v1021_v12, %v1308_v14  ;;  %1048 = vtanh.f32 %v258_v8 }
  0xaf   : > { %v1025_v19 = vpop.eup %1024  ;;  %629 = vst [vmem:[%s1319_s29 + $0x338] sm:$0xff] %v501_v13  ;;  %v503_v20 = vmul.f32 %v1023_v16, %v1308_v14  ;;  %1050 = vtanh.f32 %v259_v11 }
  0xb0   : > { %v1027_v22 = vpop.eup %1026  ;;  %630 = vst [vmem:[%s1319_s29 + $0x340] sm:$0xff] %v502_v17  ;;  %v504_v23 = vmul.f32 %v1025_v19, %v1308_v14  ;;  %1052 = vtanh.f32 %v260_v15 }
  0xb1   : > { %v1029_v25 = vpop.eup %1028  ;;  %631 = vst [vmem:[%s1319_s29 + $0x348] sm:$0xff] %v503_v20  ;;  %v505_v26 = vmul.f32 %v1027_v22, %v1308_v14  ;;  %1054 = vtanh.f32 %v261_v18 }
  0xb2   : > { %v1031_v28 = vpop.eup %1030  ;;  %632 = vst [vmem:[%s1319_s29 + $0x350] sm:$0xff] %v504_v23  ;;  %v506_v29 = vmul.f32 %v1029_v25, %v1308_v14  ;;  %1056 = vtanh.f32 %v262_v21 }
  0xb3   : > { %v1033_v31 = vpop.eup %1032  ;;  %633 = vst [vmem:[%s1319_s29 + $0x358] sm:$0xff] %v505_v26  ;;  %v507_v32 = vmul.f32 %v1031_v28, %v1308_v14  ;;  %1058 = vtanh.f32 %v263_v24 }
  0xb4   : > { %v1035_v34 = vpop.eup %1034  ;;  %634 = vst [vmem:[%s1319_s29 + $0x360] sm:$0xff] %v506_v29  ;;  %v508_v35 = vmul.f32 %v1033_v31, %v1308_v14  ;;  %1060 = vtanh.f32 %v264_v27 }
  0xb5   : > { %v1037_v37 = vpop.eup %1036  ;;  %635 = vst [vmem:[%s1319_s29 + $0x368] sm:$0xff] %v507_v32  ;;  %v509_v38 = vmul.f32 %v1035_v34, %v1308_v14  ;;  %1062 = vtanh.f32 %v265_v30 }
  0xb6   : > { %v1039_v39 = vpop.eup %1038  ;;  %636 = vst [vmem:[%s1319_s29 + $0x370] sm:$0xff] %v508_v35  ;;  %v510_v40 = vmul.f32 %v1037_v37, %v1308_v14  ;;  %1064 = vtanh.f32 %v266_v33 }
  0xb7   : > { %v1041_v41 = vpop.eup %1040  ;;  %637 = vst [vmem:[%s1319_s29 + $0x378] sm:$0xff] %v509_v38  ;;  %v511_v42 = vmul.f32 %v1039_v39, %v1308_v14  ;;  %1066 = vtanh.f32 %v267_v36 }
  0xb8   : > { %v1043_v43 = vpop.eup %1042  ;;  %638 = vst [vmem:[%s1319_s29 + $0x380] sm:$0xff] %v510_v40  ;;  %v512_v44 = vmul.f32 %v1041_v41, %v1308_v14 }
  0xb9   : > { %v1045_v45 = vpop.eup %1044  ;;  %639 = vst [vmem:[%s1319_s29 + $0x388] sm:$0xff] %v511_v42  ;;  %v513_v46 = vmul.f32 %v1043_v43, %v1308_v14 }
  0xba   : > { %v1047_v47 = vpop.eup %1046  ;;  %640 = vst [vmem:[%s1319_s29 + $0x390] sm:$0xff] %v512_v44  ;;  %v514_v48 = vmul.f32 %v1045_v45, %v1308_v14 }
  0xbb   : > { %v1049_v49 = vpop.eup %1048  ;;  %641 = vst [vmem:[%s1319_s29 + $0x398] sm:$0xff] %v513_v46  ;;  %v515_v50 = vmul.f32 %v1047_v47, %v1308_v14 }
  0xbc   : > { %v1051_v51 = vpop.eup %1050  ;;  %642 = vst [vmem:[%s1319_s29 + $0x3a0] sm:$0xff] %v514_v48  ;;  %v516_v52 = vmul.f32 %v1049_v49, %v1308_v14 }
  0xbd   : > { %v1053_v53 = vpop.eup %1052  ;;  %643 = vst [vmem:[%s1319_s29 + $0x3a8] sm:$0xff] %v515_v50  ;;  %v517_v54 = vmul.f32 %v1051_v51, %v1308_v14 }
  0xbe   : > { %v1055_v55 = vpop.eup %1054  ;;  %644 = vst [vmem:[%s1319_s29 + $0x3b0] sm:$0xff] %v516_v52  ;;  %v518_v56 = vmul.f32 %v1053_v53, %v1308_v14 }
  0xbf   : > { %v1057_v57 = vpop.eup %1056  ;;  %645 = vst [vmem:[%s1319_s29 + $0x3b8] sm:$0xff] %v517_v54  ;;  %v519_v58 = vmul.f32 %v1055_v55, %v1308_v14 }
  0xc0   : > { %v1059_v59 = vpop.eup %1058  ;;  %646 = vst [vmem:[%s1319_s29 + $0x3c0] sm:$0xff] %v518_v56  ;;  %v520_v60 = vmul.f32 %v1057_v57, %v1308_v14 }
  0xc1   : > { %v1061_v61 = vpop.eup %1060  ;;  %647 = vst [vmem:[%s1319_s29 + $0x3c8] sm:$0xff] %v519_v58  ;;  %v521_v62 = vmul.f32 %v1059_v59, %v1308_v14 }
  0xc2   : > { %v1063_v63 = vpop.eup %1062  ;;  %648 = vst [vmem:[%s1319_s29 + $0x3d0] sm:$0xff] %v520_v60  ;;  %v522_v0 = vmul.f32 %v1061_v61, %v1308_v14 }
  0xc3   : > { %v1065_v1 = vpop.eup %1064  ;;  %649 = vst [vmem:[%s1319_s29 + $0x3d8] sm:$0xff] %v521_v62  ;;  %v523_v2 = vmul.f32 %v1063_v63, %v1308_v14 }
  0xc4   : > { %v1067_v3 = vpop.eup %1066  ;;  %650 = vst [vmem:[%s1319_s29 + $0x3e0] sm:$0xff] %v522_v0  ;;  %v524_v4 = vmul.f32 %v1065_v1, %v1308_v14 }
  0xc5   : > { %651 = vst [vmem:[%s1319_s29 + $0x3e8] sm:$0xff] %v523_v2  ;;  %v525_v5 = vmul.f32 %v1067_v3, %v1308_v14 }
  0xc6   : > { %652 = vst [vmem:[%s1319_s29 + $0x3f0] sm:$0xff] %v524_v4 }
  0xc7   : > { %653 = vst [vmem:[%s1319_s29 + $0x3f8] sm:$0xff] %v525_v5 }
  0xc8   : > { %1109 = shalt.err (!%p1106_p9)
}
  0xc9   : > { %s1110_s18 = scalar_lea.hbm %s1685_s0, 16384  ;;  %s1114_s25 = scalar_lea.hbm %s1735_s2, 131072 }
  0xca   : > { %p1111_p13 = scmp.ne.s32.totalorder %s1685_s0, %s1110_s18  ;;  %p1115_p2 = scmp.lt.s32.totalorder %s1685_s0, %s1735_s2 }
  0xcb   : > { %p1116_p3 = scmp.lt.s32.totalorder %s1114_s25, %s1110_s18 }
  0xcc   : > { %p1112_p1 = pnand %p1111_p13, %p1744_p11 }
  0xcd   : > { %p1117_p6 = por %p1116_p3, %p1115_p2 }
  0xce   : > { %p1113_p0 = pneg %p1112_p1 }
  0xd0   : > { %p1118_p10 = pnand %p1117_p6, %p1113_p0 }
  0xd2   : > { %1121 = shalt.err (!%p1118_p10)
}
  0xd3   : > { %s1166_s30 = smov 4096   ;;  %s1167_s6 = smov 256  }
  0xd4   : > { %764 = dma.vmem_to_hbm [thread:$0]  (%p1744_p11), %s1687_s4, 16384, %s1685_s0, %s655_s8, %s1166_s30, %s1166_s30, %s1167_s6  }
  0xd5 PF: > { %p775_p12 = scmp.ge.s32.totalorder %s1160_s14, 2  ;;  %s684_s21 = sand.u32 1, %s1148_s11  }
  0xd6   : > { %p1745_p4 = scmp.ne.s32.totalorder %s1741_s23, 0  ;;  %s685_s29 = scalar_lea.sflag [#allocation6], %s684_s21 }
  0xd8   : > { %p771_p5 = pnand %p775_p12, %p1745_p4 }
  0xda   : > { %p772_p7 = pneg %p771_p5 }
  0xdc   : > { %1143 = dma.done.wait (%p772_p7), %s685_s29, 16384  }
  0xdd   : > { %1145 = vsyncadd (%p772_p7), %s685_s29, 4294950912  ;;  %p16_p8 = scmp.ge.s32.totalorder %s1211_s16, 10   ;;  %s1746_s11 = smov %s1152_s12 }
  0xde   : > { %s1747_s12 = smov %s1156_s13  ;;  %s1748_s13 = smov %s1223_s19 }
  0xdf   : > { %s1749_s14 = smov %s1211_s16  ;;  %18 = sbr.rel (!%p16_p8) target bundleno = 7 (0x7), region = 69 }
  0xe4   :  { %690 = vsyncpa [#allocation5], 1 }
  0xe5   :  { %692 = vsyncpa [#allocation5 + $0x1], 1 }
  0xe6   :  { %693 = vsyncpa [#allocation6], 1 }
  0xe7   :  { %695 = vsyncpa [#allocation6 + $0x1], 1 }

</bundles_post_ra>
